<compile_context>
chip_gen: v5e
topology: v5e:2x2
jax: 0.10.0
libtpu: 0.0.40
codegen_flags: <defaults>
</compile_context>

<pallas_src>
import jax
import jax.numpy as jnp
from jax.experimental import pallas as pl
from jax.experimental.pallas import tpu as pltpu

LANE = 128
_MIB = 1024 * 1024


def _round_up(x, m):
    return ((x + m - 1) // m) * m


# ---------------------------------------------------------------------------
# Kernels
# ---------------------------------------------------------------------------
def _encoder_kernel(x_ref, we_ref, be_ref, h_ref):
    # h = x @ W_enc^T + b_enc  (single block; hoisted out of the decoder loop
    # so it runs exactly once instead of once per D-tile / per TensorCore).
    h = jnp.dot(x_ref[...], we_ref[...], preferred_element_type=jnp.float32)
    h_ref[...] = (h + be_ref[...]).astype(h_ref.dtype)


def _decoder_softmax_kernel(h_ref, wd_ref, bd_ref, o_ref):
    # One lane-dense tile of output features: y = h @ W_dec^T + b_dec.
    y = jnp.dot(h_ref[...], wd_ref[...], preferred_element_type=jnp.float32)
    y = y + bd_ref[...]
    # Softmax over the batch axis (dim=0).  The whole batch lives in this
    # block, so a single-pass max/exp/sum is exact; columns are independent,
    # so tiling over D never splits the reduction.
    m = jnp.max(y, axis=0, keepdims=True)
    e = jnp.exp(y - m)
    s = jnp.sum(e, axis=0, keepdims=True)
    # approx=True -> EUP vrcp slot (otherwise idle after the exp); ~1e-4
    # relative error, fine for post-softmax probabilities.
    o_ref[...] = (e * pl.reciprocal(s, approx=True)).astype(o_ref.dtype)


# ---------------------------------------------------------------------------
# One-time parameter preparation (do this at init, NOT in the per-call path)
# ---------------------------------------------------------------------------
def prepare_params(w_enc, b_enc, w_dec, b_dec, *, tile_d=512, use_bf16=False):
    """Transpose weights to the kernel's stored layout and zero-pad every lane
    dimension to a multiple of 128 so all loads/stores are lane-dense
    (no masked vst).  Zero padding is mathematically exact."""
    bsz, d = w_enc.shape
    assert w_dec.shape == (d, bsz)
    assert b_enc.shape == (bsz,) and b_dec.shape == (d,)

    w_dtype = jnp.bfloat16 if use_bf16 else jnp.float32
    f32 = jnp.float32

    d_in_pad = _round_up(d, LANE)   # encoder contraction dim
    b_pad = _round_up(bsz, LANE)    # bottleneck lanes

    # Clamp tile_d down for small D (no point padding a 32-wide output to 512).
    tile_d = _round_up(tile_d, LANE)
    while tile_d > LANE and tile_d // 2 >= _round_up(d, LANE):
        tile_d //= 2
    d_out_pad = _round_up(d, tile_d)

    we_t = jnp.zeros((d_in_pad, b_pad), w_dtype).at[:d, :bsz].set(
        w_enc.T.astype(w_dtype))
    be = jnp.zeros((1, b_pad), f32).at[0, :bsz].set(b_enc.astype(f32))
    wd_t = jnp.zeros((b_pad, d_out_pad), w_dtype).at[:bsz, :d].set(
        w_dec.T.astype(w_dtype))
    bd = jnp.zeros((1, d_out_pad), f32).at[0, :d].set(b_dec.astype(f32))

    return {
        "we_t": we_t, "be": be, "wd_t": wd_t, "bd": bd,
        "d": d, "d_in_pad": d_in_pad, "b_pad": b_pad,
        "tile_d": tile_d, "d_out_pad": d_out_pad,
        "w_dtype": w_dtype, "w_bytes": 2 if use_bf16 else 4,
    }


# ---------------------------------------------------------------------------
# Forward pass
# ---------------------------------------------------------------------------
def non_negative_kernel_autoencoder_fwd(x, params):
    """x: (N, D) float; params: output of prepare_params(). Returns (N, D) f32."""
    n, d = x.shape
    assert d == params["d"]
    d_in_pad = params["d_in_pad"]
    b_pad = params["b_pad"]
    d_out_pad = params["d_out_pad"]
    tile_d = params["tile_d"]
    w_dtype = params["w_dtype"]
    w_bytes = params["w_bytes"]
    we_t, be, wd_t, bd = (params["we_t"], params["be"],
                          params["wd_t"], params["bd"])

    # Pad x only when needed (skip the copy entirely when D % 128 == 0).
    if d == d_in_pad:
        x_p = x.astype(w_dtype)
    else:
        x_p = jnp.zeros((n, d_in_pad), w_dtype).at[:, :d].set(x.astype(w_dtype))

    # --- Encoder: one-shot kernel, h = x @ W_enc^T + b_enc -> (N, b_pad) ----
    # NOTE: for very large D the resident W_enc^T block should be tiled over
    # the contraction dim; at autoencoder-scale shapes it fits VMEM easily.
    enc_need = (2 * (n * d_in_pad + d_in_pad * b_pad + n * b_pad) * w_bytes
                + 2 * b_pad * 4)
    enc_vmem = int(max(32 * _MIB, min(64 * _MIB, enc_need + 8 * _MIB)))

    h = pl.pallas_call(
        _encoder_kernel,
        out_shape=jax.ShapeDtypeStruct((n, b_pad), w_dtype),
        grid=(1,),
        in_specs=[
            pl.BlockSpec((n, d_in_pad), lambda i: (0, 0)),      # x
            pl.BlockSpec((d_in_pad, b_pad), lambda i: (0, 0)),  # W_enc^T
            pl.BlockSpec((1, b_pad), lambda i: (0, 0)),         # b_enc
        ],
        out_specs=pl.BlockSpec((n, b_pad), lambda i: (0, 0)),
        compiler_params=pltpu.CompilerParams(vmem_limit_bytes=enc_vmem),
    )(x_p, we_t, be)

    # --- Decoder + softmax(dim=0): tiled over output features D -------------
    def dec_need(tile):
        return (2 * n * b_pad * w_bytes        # resident h (double-buffered)
                + 2 * b_pad * tile * w_bytes   # W_dec^T tile
                + 2 * 1 * tile * 4             # b_dec tile
                + 2 * n * tile * 4)            # output tile

    # Shrink tile_d if the double-buffered working set would exceed a
    # conservative 48 MiB budget (keeps the config safe on v7x's 64 MiB/TC).
    while (tile_d > LANE and dec_need(tile_d) > 48 * _MIB
           and (tile_d // 2) % LANE == 0 and d_out_pad % (tile_d // 2) == 0):
        tile_d //= 2
    dec_vmem = int(max(32 * _MIB, min(64 * _MIB, dec_need(tile_d) + 8 * _MIB)))

    out = pl.pallas_call(
        _decoder_softmax_kernel,
        out_shape=jax.ShapeDtypeStruct((n, d_out_pad), jnp.float32),
        grid=(d_out_pad // tile_d,),
        in_specs=[
            pl.BlockSpec((n, b_pad), lambda j: (0, 0)),       # h (resident)
            pl.BlockSpec((b_pad, tile_d), lambda j: (0, j)),  # W_dec^T tile
            pl.BlockSpec((1, tile_d), lambda j: (0, j)),      # b_dec tile
        ],
        out_specs=pl.BlockSpec((n, tile_d), lambda j: (0, j)),
        compiler_params=pltpu.CompilerParams(
            # D tiles are independent -> shard across both TCs on v7x.
            dimension_semantics=("parallel",),
            vmem_limit_bytes=dec_vmem,
        ),
    )(h, wd_t, bd)

    # Drop zero-padded feature columns only when padding actually happened.
    return out if d_out_pad == d else out[:, :d]


def _xavier_uniform(key, shape):
    # torch.nn.init.xavier_uniform_ on a (fan_out, fan_in) Linear weight
    fan_out, fan_in = shape
    bound = (6.0 / (fan_in + fan_out)) ** 0.5
    return jax.random.uniform(key, shape, jnp.float32, -bound, bound)


if __name__ == "__main__":
    INPUT_DIM = 32
    BOTTLENECK_SIZE = 50
    BATCH = 8

    key = jax.random.PRNGKey(0)
    k_x, k_we, k_wd = jax.random.split(key, 3)

    x = jax.random.normal(k_x, (BATCH, INPUT_DIM), jnp.float32)
    w_enc = _xavier_uniform(k_we, (BOTTLENECK_SIZE, INPUT_DIM))
    b_enc = jnp.zeros((BOTTLENECK_SIZE,), jnp.float32)
    w_dec = _xavier_uniform(k_wd, (INPUT_DIM, BOTTLENECK_SIZE))
    b_dec = jnp.zeros((INPUT_DIM,), jnp.float32)

    # Reference in plain JAX (same math as the PyTorch module).
    h_ref = x @ w_enc.T + b_enc
    y_ref = h_ref @ w_dec.T + b_dec
    ref = jax.nn.softmax(y_ref, axis=0)

    # f32 MXU-operand path (exact up to the approx reciprocal in the epilogue).
    params_f32 = prepare_params(w_enc, b_enc, w_dec, b_dec, use_bf16=False)
    out_f32 = jax.block_until_ready(
        non_negative_kernel_autoencoder_fwd(x, params_f32))
    assert out_f32.shape == (BATCH, INPUT_DIM)
    assert jnp.allclose(out_f32, ref, atol=2e-3, rtol=2e-3), (
        float(jnp.max(jnp.abs(out_f32 - ref))))

    # bf16 MXU-operand path (v6e/v7x-friendly: halves W_dec HBM bytes & VMEM).
    params_bf16 = prepare_params(w_enc, b_enc, w_dec, b_dec, use_bf16=True)
    out_bf16 = jax.block_until_ready(
        non_negative_kernel_autoencoder_fwd(x, params_bf16))
    assert out_bf16.shape == (BATCH, INPUT_DIM)
    assert jnp.allclose(out_bf16, ref, atol=2e-2, rtol=2e-2), (
        float(jnp.max(jnp.abs(out_bf16 - ref))))

    print("KERNEL_OK")
</pallas_src>

<mosaic_0001>
module attributes {stable_mosaic.version = 11 : i64} {
  func.func @_encoder_kernel(%arg0: i32, %arg1: memref<8x128xf32, #tpu.memory_space<vmem>>, %arg2: memref<128x128xf32, #tpu.memory_space<vmem>>, %arg3: memref<1x128xf32, #tpu.memory_space<vmem>>, %arg4: memref<8x128xf32, #tpu.memory_space<vmem>>) attributes {dimension_semantics = [#tpu.dimension_semantics<arbitrary>], iteration_bounds = array<i64: 1>, scalar_prefetch = 0 : i64, scratch_operands = 0 : i64, tpu.core_type = #tpu.core_type<tc>, window_params = [{pipeline_mode = #tpu.pipeline_mode<synchronous>, transform_indices = @transform_0, window_bounds = array<i64: 8, 128>}, {pipeline_mode = #tpu.pipeline_mode<synchronous>, transform_indices = @transform_1, window_bounds = array<i64: 128, 128>}, {pipeline_mode = #tpu.pipeline_mode<synchronous>, transform_indices = @transform_2, window_bounds = array<i64: 1, 128>}, {pipeline_mode = #tpu.pipeline_mode<synchronous>, transform_indices = @transform_3, window_bounds = array<i64: 8, 128>}]} {
    %c0 = arith.constant 0 : index
    %c0_0 = arith.constant 0 : index
    %0 = vector.load %arg1[%c0, %c0_0] : memref<8x128xf32, #tpu.memory_space<vmem>>, vector<8x128xf32>
    %c0_1 = arith.constant 0 : index
    %c0_2 = arith.constant 0 : index
    %1 = vector.load %arg2[%c0_1, %c0_2] : memref<128x128xf32, #tpu.memory_space<vmem>>, vector<128x128xf32>
    %cst = arith.constant dense<0.000000e+00> : vector<8x128xf32>
    %2 = tpu.matmul %0, %1, %cst {dimension_numbers = #tpu.dot_dimension_numbers<[1], [0], [0], [1], [0, 0, 1, 1], [], []>} : vector<8x128xf32>, vector<128x128xf32>, vector<8x128xf32> -> vector<8x128xf32>
    %c0_3 = arith.constant 0 : index
    %c0_4 = arith.constant 0 : index
    %3 = vector.load %arg3[%c0_3, %c0_4] : memref<1x128xf32, #tpu.memory_space<vmem>>, vector<1x128xf32>
    %4 = vector.broadcast %3 : vector<1x128xf32> to vector<8x128xf32>
    %5 = arith.addf %2, %4 : vector<8x128xf32>
    %c0_5 = arith.constant 0 : index
    %c0_6 = arith.constant 0 : index
    %6 = vector.load %arg4[%c0_5, %c0_6] : memref<8x128xf32, #tpu.memory_space<vmem>>, vector<8x128xf32>
    tpu.vector_store %arg4[%c0_5, %c0_6], %5 {strides = array<i32>} : memref<8x128xf32, #tpu.memory_space<vmem>>, vector<8x128xf32>,
    return
  }
  func.func @transform_0(%arg0: i32) -> (i32, i32) {
    %c0_i32 = arith.constant 0 : i32
    %c0_i32_0 = arith.constant 0 : i32
    %c0_i32_1 = arith.constant 0 : i32
    return %c0_i32, %c0_i32_0 : i32, i32
  }
  func.func @transform_1(%arg0: i32) -> (i32, i32) {
    %c0_i32 = arith.constant 0 : i32
    %c0_i32_0 = arith.constant 0 : i32
    %c0_i32_1 = arith.constant 0 : i32
    return %c0_i32, %c0_i32_0 : i32, i32
  }
  func.func @transform_2(%arg0: i32) -> (i32, i32) {
    %c0_i32 = arith.constant 0 : i32
    %c0_i32_0 = arith.constant 0 : i32
    %c0_i32_1 = arith.constant 0 : i32
    return %c0_i32, %c0_i32_0 : i32, i32
  }
  func.func @transform_3(%arg0: i32) -> (i32, i32) {
    %c0_i32 = arith.constant 0 : i32
    %c0_i32_0 = arith.constant 0 : i32
    %c0_i32_1 = arith.constant 0 : i32
    return %c0_i32, %c0_i32_0 : i32, i32
  }
}

</mosaic_0001>

<bundles_post_ra>
// kernel: tpu_custom_call.1
= control target key start
LH: loop header
LB: loop body
LE: loop exit
PB: predicated region body
PF: predicated region fallthrough
CT: control target
= control target key end

     0   :  { %8 = vsyncpa [#allocation3], 0  ;;  %s226_s0 = inlined_call_operand.hbm [shape: f32[8,128], index: 0, kind: input, shape index: {}]   ;;  %s227_s1 = inlined_call_operand.hbm [shape: f32[128,128], index: 1, kind: input, shape index: {}]   ;;  %s228_s2 = inlined_call_operand.vmem [shape: f32[1,128], index: 2, kind: input, shape index: {}]   ;;  %s229_s3 = inlined_call_operand.hbm [shape: f32[8,128], index: 3, kind: output, shape index: {}]  }
   0x1   :  { %9 = vsyncpa [#allocation6], 0 }
   0x2   :  { %10 = vsyncpa [#allocation4], 0  ;;  %s16_s14 = sshll.u32 %s226_s0, 4  ;;  %s189_s15 = smov [#allocation2]   ;;  %s17_s14 = int_to_ptr.hbm [resolvable:$true] %s16_s14 }
   0x3   :  { %s18_s16 = sshll.u32 %s189_s15, 4  ;;  %s26_s19 = sshll.u32 %s227_s1, 4  ;;  %s19_s16 = int_to_ptr.vmem [resolvable:$true] %s18_s16  ;;  %s27_s19 = int_to_ptr.hbm [resolvable:$true] %s26_s19 }
   0x4   :  { %21 = dma.hbm_to_vmem [thread:$0]  %s17_s14, 128, %s19_s16, [#allocation3]  }
   0x5   :  { %s190_s20 = smov [#allocation5]   ;;  %s191_s22 = smov 128  }
   0x6   :  { %s28_s21 = sshll.u32 %s190_s20, 4  ;;  %s192_s23 = smov 8   ;;  %s29_s21 = int_to_ptr.vmem [resolvable:$true] %s28_s21 }
   0x7   :  { %34 = dma.hbm_to_vmem [thread:$0]  %s27_s19, 2048, %s29_s21, [#allocation6], %s191_s22, %s191_s22, %s192_s23  }
   0x8   :  { %183 = dma.done.wait [#allocation3], 128  }
   0x9   :  { %184 = vsyncadd [#allocation3], 4294967168 }
   0xa   :  { %185 = dma.done.wait [#allocation6], 2048  }
   0xb   :  { %186 = vsyncadd [#allocation6], 4294965248  ;;  %v61_v0 = vld [vmem:[#allocation5 + $0x78] sm:$0xff]  ;;  %v60_v1 = vld [vmem:[#allocation5 + $0x70] sm:$0xff]  ;;  %s193_s24 = smov [#allocation7]   ;;  %s94_s28 = sshll.u32 %s229_s3, 4  ;;  %s95_s28 = int_to_ptr.hbm [resolvable:$true] %s94_s28 }
   0xc   :  { %66 = vmatpush.msra.mxu0 %v61_v0  ;;  %v59_v2 = vld [vmem:[#allocation5 + $0x68] sm:$0xff]  ;;  %v58_v3 = vld [vmem:[#allocation5 + $0x60] sm:$0xff]  ;;  %v57_v4 = vld [vmem:[#allocation5 + $0x58] sm:$0xff]  ;;  %s92_s25 = sshll.u32 %s193_s24, 4  ;;  %s93_s25 = int_to_ptr.vmem [resolvable:$true] %s92_s25 }
   0xd   :  { %v56_v5 = vld [vmem:[#allocation5 + $0x50] sm:$0xff]  ;;  %v55_v6 = vld [vmem:[#allocation5 + $0x48] sm:$0xff]  ;;  %v54_v7 = vld [vmem:[#allocation5 + $0x40] sm:$0xff] }
   0xe   :  { %67 = vmatpush.msra.mxu0 %v60_v1  ;;  %v53_v8 = vld [vmem:[#allocation5 + $0x38] sm:$0xff]  ;;  %v52_v9 = vld [vmem:[#allocation5 + $0x30] sm:$0xff]  ;;  %v51_v10 = vld [vmem:[#allocation5 + $0x28] sm:$0xff] }
   0xf   :  { %v50_v11 = vld [vmem:[#allocation5 + $0x20] sm:$0xff]  ;;  %v49_v12 = vld [vmem:[#allocation5 + $0x18] sm:$0xff]  ;;  %v48_v13 = vld [vmem:[#allocation5 + $0x10] sm:$0xff] }
  0x10   :  { %68 = vmatpush.msra.mxu0 %v59_v2  ;;  %v47_v14 = vld [vmem:[#allocation5 + $0x8] sm:$0xff]  ;;  %v46_v15 = vld [vmem:[#allocation5] sm:$0xff]  ;;  %v45_v16 = vld [vmem:[#allocation2] sm:$0xff] }
  0x11   :  { %v110_v17 = vld [vmem:[%s228_s2] ss:$0 sm:$0xff] }
  0x12   :  { %69 = vmatpush.msra.mxu0 %v58_v3 }
  0x14   :  { %70 = vmatpush.msra.mxu0 %v57_v4 }
  0x16   :  { %71 = vmatpush.msra.mxu0 %v56_v5 }
  0x18   :  { %72 = vmatpush.msra.mxu0 %v55_v6 }
  0x1a   :  { %73 = vmatpush.msra.mxu0 %v54_v7 }
  0x1c   :  { %74 = vmatpush.msra.mxu0 %v53_v8 }
  0x1e   :  { %75 = vmatpush.msra.mxu0 %v52_v9 }
  0x20   :  { %76 = vmatpush.msra.mxu0 %v51_v10 }
  0x22   :  { %77 = vmatpush.msra.mxu0 %v50_v11 }
  0x24   :  { %78 = vmatpush.msra.mxu0 %v49_v12 }
  0x26   :  { %79 = vmatpush.msra.mxu0 %v48_v13 }
  0x28   :  { %80 = vmatpush.msra.mxu0 %v47_v14 }
  0x2a   :  { %81 = vmatpush.msra.mxu0 %v46_v15 }
  0x2b   :  { %82 = vmatmul.f32.vlgmr.msra.gmra.mxu0 %v45_v16 }
  0xa8   :  { %v83_v18 = vpop.f32.mrf.mxu0 }
  0xa9   :  { %v84_v19 = vadd.f32 %v110_v17, %v83_v18 }
  0xab   :  { %86 = vst [vmem:[#allocation7] sm:$0xff] %v84_v19 }
  0xac   :  { %97 = dma.vmem_to_hbm [thread:$0]  %s93_s25, 128, %s95_s28, [#allocation4]  }
  0xad   :  { %187 = dma.done.wait [#allocation4], 128  }
  0xae   :  { %188 = vsyncadd [#allocation4], 4294967168 }
  0xaf   :  { %102 = vsyncpa [#allocation3], 1 }
  0xb0   :  { %103 = vsyncpa [#allocation6], 1 }
  0xb1   :  { %104 = vsyncpa [#allocation4], 1 }

</bundles_post_ra>
